<compile_context>
chip_gen: v6e
topology: v6e:2x2x1
jax: 0.10.0
libtpu: 0.0.40
codegen_flags: <defaults>
</compile_context>

<pallas_src>
import jax
import jax.numpy as jnp
from jax import lax
from jax.experimental import pallas as pl
from jax.experimental.pallas import tpu as pltpu

EPS = 1e-5


def _round_up(x, m):
    return ((x + m - 1) // m) * m


def _stats_kernel(x_ref, sum_ref, sumsq_ref):
    # x_ref: (TC, TL) -- batch dim squeezed.  sum_ref/sumsq_ref: (TC, 1) f32.
    # The output block index depends only on the channel-tile grid axis, so the
    # accumulators stay VMEM-resident across the (N, L-tile) reduction axes
    # (standard init/accumulate pattern via pl.when).
    first = jnp.logical_and(pl.program_id(1) == 0, pl.program_id(2) == 0)

    @pl.when(first)
    def _():
        sum_ref[...] = jnp.zeros_like(sum_ref)
        sumsq_ref[...] = jnp.zeros_like(sumsq_ref)

    x = x_ref[...].astype(jnp.float32)
    sum_ref[...] += jnp.sum(x, axis=-1, keepdims=True)
    sumsq_ref[...] += jnp.sum(x * x, axis=-1, keepdims=True)


def _normalize_kernel(x_ref, scale_ref, shift_ref, out_ref):
    # x_ref/out_ref: (TC, TL); scale_ref/shift_ref: (TC, 1), broadcast on lanes.
    x = x_ref[...].astype(jnp.float32)
    out_ref[...] = (x * scale_ref[...] + shift_ref[...]).astype(out_ref.dtype)


def basic_presparse_normalizer(x, gamma=None, beta=None, *, eps=EPS):
    """x: (N, C, L); gamma, beta: (C,) or None (affine=False). Returns (N, C, L)."""
    n, c, l = x.shape

    # --- tile sizing (lane-dense, multiple-of-(8,128) blocks, ~2 MiB fp32) ---
    tc = min(_round_up(c, 8), 256)
    c_pad = _round_up(c, tc)
    target_tl = max(512, (2 * 1024 * 1024 // 4) // tc)
    tl = min(_round_up(l, 128), _round_up(target_tl, 128))
    l_pad = _round_up(l, tl)

    xp = x
    if c_pad != c or l_pad != l:
        # Zero padding: contributes 0 to sum / sum-of-squares; divide by true
        # count below.  Padded channels are sliced away at the end.
        xp = jnp.pad(x, ((0, 0), (0, c_pad - c), (0, l_pad - l)))

    grid = (c_pad // tc, n, l_pad // tl)

    # ---------------- pass 1: per-channel sum and sum of squares ----------------
    sums, sumsqs = pl.pallas_call(
        _stats_kernel,
        out_shape=(
            jax.ShapeDtypeStruct((c_pad, 1), jnp.float32),
            jax.ShapeDtypeStruct((c_pad, 1), jnp.float32),
        ),
        grid=grid,
        in_specs=[
            pl.BlockSpec((None, tc, tl), lambda ci, ni, li: (ni, ci, li)),
        ],
        out_specs=(
            pl.BlockSpec((tc, 1), lambda ci, ni, li: (ci, 0)),
            pl.BlockSpec((tc, 1), lambda ci, ni, li: (ci, 0)),
        ),
        compiler_params=pltpu.CompilerParams(
            dimension_semantics=("parallel", "arbitrary", "arbitrary")
        ),
    )(xp)

    # ---- tiny per-channel glue (C elements): fold stats + affine params into
    # ---- a single scale/shift so the normalize pass is 2 ops per element ----
    count = jnp.float32(n * l)  # true element count (padding excluded)
    mean = sums / count
    # Biased variance (PyTorch normalization uses the biased estimator).
    # f32 accumulation keeps E[x^2] - mean^2 cancellation within tolerance.
    var = jnp.maximum(sumsqs / count - mean * mean, 0.0)
    inv_std = lax.rsqrt(var + eps)

    if gamma is None:
        gamma_p = jnp.ones((c_pad, 1), jnp.float32)
    else:
        gamma_p = jnp.pad(gamma.astype(jnp.float32), (0, c_pad - c)).reshape(c_pad, 1)
    if beta is None:
        beta_p = jnp.zeros((c_pad, 1), jnp.float32)
    else:
        beta_p = jnp.pad(beta.astype(jnp.float32), (0, c_pad - c)).reshape(c_pad, 1)

    scale = gamma_p * inv_std
    shift = beta_p - mean * scale

    # ---------------- pass 2: y = x * scale + shift ----------------
    out_p = pl.pallas_call(
        _normalize_kernel,
        out_shape=jax.ShapeDtypeStruct((n, c_pad, l_pad), x.dtype),
        grid=grid,
        in_specs=[
            pl.BlockSpec((None, tc, tl), lambda ci, ni, li: (ni, ci, li)),
            pl.BlockSpec((tc, 1), lambda ci, ni, li: (ci, 0)),
            pl.BlockSpec((tc, 1), lambda ci, ni, li: (ci, 0)),
        ],
        out_specs=pl.BlockSpec((None, tc, tl), lambda ci, ni, li: (ni, ci, li)),
        compiler_params=pltpu.CompilerParams(
            dimension_semantics=("parallel", "parallel", "parallel")
        ),
    )(xp, scale, shift)

    if c_pad != c or l_pad != l:
        out_p = out_p[:, :c, :l]
    return out_p


if __name__ == "__main__":
    key = jax.random.PRNGKey(0)
    k_x, k_g, k_b = jax.random.split(key, 3)

    batch, num_motifs, seq_len = 2, 4, 16  # small NCL shapes

    x = jax.random.normal(k_x, (batch, num_motifs, seq_len), dtype=jnp.float32) * 3.0 + 1.5
    # affine=True parameters (deterministic, synthetic -- not a checkpoint load)
    gamma = 1.0 + 0.1 * jax.random.normal(k_g, (num_motifs,), dtype=jnp.float32)
    beta = 0.1 * jax.random.normal(k_b, (num_motifs,), dtype=jnp.float32)

    out = basic_presparse_normalizer(x, gamma, beta)
    jax.block_until_ready(out)

    # Plain-JAX reference for training-mode BatchNorm1d semantics.
    mean = jnp.mean(x, axis=(0, 2), keepdims=True)
    var = jnp.mean((x - mean) ** 2, axis=(0, 2), keepdims=True)
    ref = (x - mean) / jnp.sqrt(var + EPS) * gamma[None, :, None] + beta[None, :, None]
    assert out.shape == x.shape
    assert jnp.allclose(out, ref, atol=1e-5, rtol=1e-5), "mismatch vs reference"

    print("KERNEL_OK")
</pallas_src>

<mosaic_0001>
module attributes {stable_mosaic.version = 11 : i64} {
  func.func @_stats_kernel(%arg0: i32, %arg1: i32, %arg2: i32, %arg3: memref<1x8x128xf32, #tpu.memory_space<vmem>>, %arg4: memref<8x1xf32, #tpu.memory_space<vmem>>, %arg5: memref<8x1xf32, #tpu.memory_space<vmem>>) attributes {dimension_semantics = [#tpu.dimension_semantics<parallel>, #tpu.dimension_semantics<arbitrary>, #tpu.dimension_semantics<arbitrary>], iteration_bounds = array<i64: 1, 2, 1>, scalar_prefetch = 0 : i64, scratch_operands = 0 : i64, tpu.core_type = #tpu.core_type<tc>, window_params = [{transform_indices = @transform_0, window_bounds = array<i64: 1, 8, 128>}, {transform_indices = @transform_1, window_bounds = array<i64: 8, 1>}, {transform_indices = @transform_2, window_bounds = array<i64: 8, 1>}]} {
    %c0_i32 = arith.constant 0 : i32
    %0 = arith.cmpi eq, %arg1, %c0_i32 : i32
    %c0_i32_0 = arith.constant 0 : i32
    %1 = arith.cmpi eq, %arg2, %c0_i32_0 : i32
    %2 = arith.andi %0, %1 : i1
    %3 = arith.extui %2 : i1 to i32
    %c0_i32_1 = arith.constant 0 : i32
    %4 = arith.cmpi ne, %3, %c0_i32_1 : i32
    scf.if %4 {
      %cst_13 = arith.constant 0.000000e+00 : f32
      %18 = vector.broadcast %cst_13 : f32 to vector<8x1xf32>
      %c0_14 = arith.constant 0 : index
      %c0_15 = arith.constant 0 : index
      %19 = vector.load %arg4[%c0_14, %c0_15] : memref<8x1xf32, #tpu.memory_space<vmem>>, vector<8x1xf32>
      tpu.vector_store %arg4[%c0_14, %c0_15], %18 {strides = array<i32>} : memref<8x1xf32, #tpu.memory_space<vmem>>, vector<8x1xf32>,
      %cst_16 = arith.constant 0.000000e+00 : f32
      %20 = vector.broadcast %cst_16 : f32 to vector<8x1xf32>
      %c0_17 = arith.constant 0 : index
      %c0_18 = arith.constant 0 : index
      %21 = vector.load %arg5[%c0_17, %c0_18] : memref<8x1xf32, #tpu.memory_space<vmem>>, vector<8x1xf32>
      tpu.vector_store %arg5[%c0_17, %c0_18], %20 {strides = array<i32>} : memref<8x1xf32, #tpu.memory_space<vmem>>, vector<8x1xf32>,
    } else {
    }
    %c0 = arith.constant 0 : index
    %c0_2 = arith.constant 0 : index
    %c0_3 = arith.constant 0 : index
    %5 = vector.load %arg3[%c0, %c0_2, %c0_3] : memref<1x8x128xf32, #tpu.memory_space<vmem>>, vector<1x8x128xf32>
    %6 = vector.shape_cast %5 : vector<1x8x128xf32> to vector<8x128xf32>
    %c0_4 = arith.constant 0 : index
    %c0_5 = arith.constant 0 : index
    %7 = vector.load %arg4[%c0_4, %c0_5] : memref<8x1xf32, #tpu.memory_space<vmem>>, vector<8x1xf32>
    %cst = arith.constant dense<0.000000e+00> : vector<8xf32>
    %8 = vector.multi_reduction <add>, %6, %cst [1] : vector<8x128xf32> to vector<8xf32>
    %9 = vector.shape_cast %8 : vector<8xf32> to vector<8x1xf32>
    %10 = arith.addf %7, %9 : vector<8x1xf32>
    %c0_6 = arith.constant 0 : index
    %c0_7 = arith.constant 0 : index
    %11 = vector.load %arg4[%c0_6, %c0_7] : memref<8x1xf32, #tpu.memory_space<vmem>>, vector<8x1xf32>
    tpu.vector_store %arg4[%c0_6, %c0_7], %10 {strides = array<i32>} : memref<8x1xf32, #tpu.memory_space<vmem>>, vector<8x1xf32>,
    %c0_8 = arith.constant 0 : index
    %c0_9 = arith.constant 0 : index
    %12 = vector.load %arg5[%c0_8, %c0_9] : memref<8x1xf32, #tpu.memory_space<vmem>>, vector<8x1xf32>
    %13 = arith.mulf %6, %6 : vector<8x128xf32>
    %cst_10 = arith.constant dense<0.000000e+00> : vector<8xf32>
    %14 = vector.multi_reduction <add>, %13, %cst_10 [1] : vector<8x128xf32> to vector<8xf32>
    %15 = vector.shape_cast %14 : vector<8xf32> to vector<8x1xf32>
    %16 = arith.addf %12, %15 : vector<8x1xf32>
    %c0_11 = arith.constant 0 : index
    %c0_12 = arith.constant 0 : index
    %17 = vector.load %arg5[%c0_11, %c0_12] : memref<8x1xf32, #tpu.memory_space<vmem>>, vector<8x1xf32>
    tpu.vector_store %arg5[%c0_11, %c0_12], %16 {strides = array<i32>} : memref<8x1xf32, #tpu.memory_space<vmem>>, vector<8x1xf32>,
    return
  }
  func.func @transform_0(%arg0: i32, %arg1: i32, %arg2: i32) -> (i32, i32, i32) {
    %c0_i32 = arith.constant 0 : i32
    return %arg1, %arg0, %arg2 : i32, i32, i32
  }
  func.func @transform_1(%arg0: i32, %arg1: i32, %arg2: i32) -> (i32, i32) {
    %c0_i32 = arith.constant 0 : i32
    %c0_i32_0 = arith.constant 0 : i32
    return %arg0, %c0_i32 : i32, i32
  }
  func.func @transform_2(%arg0: i32, %arg1: i32, %arg2: i32) -> (i32, i32) {
    %c0_i32 = arith.constant 0 : i32
    %c0_i32_0 = arith.constant 0 : i32
    return %arg0, %c0_i32 : i32, i32
  }
}

</mosaic_0001>

<bundles_post_ra>
// kernel: tpu_custom_call.1
= control target key start
LH: loop header
LB: loop body
LE: loop exit
PB: predicated region body
PF: predicated region fallthrough
CT: control target
= control target key end

     0   :  { %8 = vsyncpa [#allocation3], 0  ;;  %s600_s0 = inlined_call_operand.hbm [shape: f32[2,8,128], index: 0, kind: input, shape index: {}]   ;;  %s601_s1 = inlined_call_operand.vmem [shape: f32[8,1], index: 1, kind: output, shape index: {0}]   ;;  %s602_s2 = inlined_call_operand.vmem [shape: f32[8,1], index: 2, kind: output, shape index: {1}]  }
   0x1   :  { %10 = vsyncpa [#allocation3 + $0x1], 0  ;;  %s486_s9 = smov 0   ;;  %s488_s10 = smov 0  }
   0x2   :  { %s490_s11 = smov 0   ;;  %s492_s12 = smov 0  }
   0x3   :  { %s494_s13 = smov 0   ;;  %s496_s14 = smov 0  }
   0x4 LB: > { %s320_s15 = sadd.s32 4294967295, %s467_s14   ;;  %s31_s16 = sadd.s32 1, %s463_s13  ;;  %s467_s14 = sphi %s496_s14, %s16_s14   ;;  %s463_s13 = sphi %s494_s13, %s610_s13   ;;  %s459_s12 = sphi %s492_s12, %s609_s12   ;;  %s455_s11 = sphi %s490_s11, %s608_s11   ;;  %s451_s10 = sphi %s488_s10, %s607_s10   ;;  %s447_s9 = sphi %s486_s9, %s606_s9  }
   0x5   : > { %p33_p0 = scmp.ge.s32.totalorder %s31_s16, 2  ;;  %s46_s17 = sadd.s32 1, %s455_s11 }
   0x6   : > { %p53_p1 = scmp.ne.s32.totalorder %s455_s11, %s451_s10  ;;  %p54_p2 = scmp.eq.s32.totalorder %s467_s14, 0 }
   0x7   : > { %s612_s16 = smov (%p33_p0, %s31_s16), 0  ;;  %p59_p4 = scmp.ne.s32.totalorder %s451_s10, %s447_s9 }
   0x8   : > { %p522_p3 = por %p54_p2, %p53_p1  ;;  %s39_s19 = ssub.s32 %s463_s13, %s612_s16 }
   0x9   : > { %p60_p5 = scmp.eq.s32.totalorder %s320_s15, 0  ;;  %p44_p6 = scmp.eq.s32.totalorder %s39_s19, 0 }
   0xa   : > { %p339_p8 = scmp.lt.s32.totalorder %s467_s14, 2  ;;  %s135_s22 = sand.u32 1, %s455_s11  }
   0xb   : > { %p529_p7 = por %p60_p5, %p59_p4  ;;  %s324_s23 = sshll.u32 %s463_s13, 7 }
   0xc   : > { %s535_s21 = scalar_select %p44_p6, %s455_s11, %s46_s17  }
   0xd   : > { %s323_s24 = sshll.u32 %s135_s22, 3  ;;  %s146_s27 = scalar_lea.hbm %s600_s0, %s324_s23 }
   0xe   : > { %s139_s28 = scalar_lea.vmem [#allocation2], %s323_s24  ;;  %p544_p9 = pnand %p339_p8, %p522_p3 }
   0xf   : > { %s148_s29 = sshll.u32 %s139_s28, 4  ;;  %p325_p10 = scmp.ge.s32.totalorder %s467_s14, 1  ;;  %s149_s29 = int_to_ptr.vmem [resolvable:$true] %s148_s29 }
  0x10   : > { %p153_p11 = scmp.lt.s32.totalorder %s467_s14, 3  ;;  %s136_s3 = scalar_lea.sflag [#allocation3], %s135_s22 }
  0x11   : > { %p391_p12 = pneg %p544_p9  ;;  %s402_s4 = scalar_lea.vmem %s149_s29, 128 }
  0x12   : > { %p403_p13 = scmp.ne.s32.totalorder %s149_s29, %s402_s4  ;;  %s469_s5 = smov [#allocation2]  }
  0x13   : > { %s407_s6 = sshll.u32 %s469_s5, 4  ;;  %s408_s6 = int_to_ptr.vmem [resolvable:$false] %s407_s6 }
  0x14   : > { %p405_p0 = pnand %p403_p13, %p391_p12  ;;  %s409_s7 = scalar_lea.vmem %s408_s6, 256 }
  0x15   : > { %p410_p2 = scmp.lt.s32.totalorder %s149_s29, %s408_s6  ;;  %p411_p3 = scmp.lt.s32.totalorder %s409_s7, %s402_s4 }
  0x16   : > { %p406_p1 = pneg %p405_p0 }
  0x17   : > { %p412_p4 = por %p411_p3, %p410_p2 }
  0x19   : > { %p413_p5 = pnand %p412_p4, %p406_p1 }
  0x1b   : > { %416 = shalt.err (!%p413_p5)
}
  0x1c   : > { %338 = dma.hbm_to_vmem [thread:$0]  (!%p544_p9), %s146_s27, 128, %s149_s29, %s136_s3  }
  0x1d   : > { %p154_p6 = pnand %p325_p10, %p153_p11 }
  0x1e   : > { %s159_s8 = sand.u32 (!%p154_p6), 1, %s451_s10  }
  0x1f   : > { %157 = sbr.rel (%p154_p6) target bundleno = 190 (0xbe), region = 24  ;;  %s326_s9 = sshll.u32 (!%p154_p6), %s159_s8, 3 }
  0x20   : > { %s160_s15 = scalar_lea.sflag (!%p154_p6), [#allocation3], %s159_s8  ;;  %s163_s17 = scalar_lea.vmem (!%p154_p6), [#allocation2], %s326_s9 }
  0x24   : > { %442 = dma.done.wait (%p529_p7), %s160_s15, 128  }
  0x25   : > { %444 = vsyncadd (%p529_p7), %s160_s15, 4294967168  ;;  %p195_p8 = scmp.eq.s32.totalorder %s459_s12, 0 }
  0x26   : > { %vm201_vm0 = vcmask (%p195_p8), 7168   ;;  %v470_v0 = vmov (%p195_p8), 0.0  }
  0x27   : > { %200 = sbr.rel (!%p195_p8) target bundleno = 44 (0x2c), region = 32  ;;  %202 = vst.msk [vmem:[%s601_s1] sm:$0xff] (%p195_p8), %vm201_vm0, %v470_v0  ;;  %203 = vst.msk [vmem:[%s602_s2] sm:$0xff] (%p195_p8), %vm201_vm0, %v470_v0 }
  0x2c PF: > { %v204_v1 = vld [vmem:[%s163_s17] sm:$0xff]  ;;  %vm209_vm1 = vcmask 7168  }
  0x2d   : > { %206 = vadd.xlane.f32.xlu0 %v204_v1  ;;  %v212_v2 = vmul.f32 %v204_v1, %v204_v1 }
  0x2e   : > { %v205_v3 = vld [vmem:[%s601_s1] sm:$0xff] }
  0x2f   : > { %v211_v6 = vld [vmem:[%s602_s2] sm:$0xff] }
  0x31   : > { %213 = vadd.xlane.f32.xlu0 %v212_v2 }
  0xb6   : > { %v207_v4 = vpop.xlane.xlu0 %206 }
  0xb7   : > { %v208_v5 = vadd.f32 %v207_v4, %v205_v3 }
  0xb9   : > { %210 = vst.msk [vmem:[%s601_s1] sm:$0xff] %vm209_vm1, %v208_v5 }
  0xba   : > { %v214_v7 = vpop.xlane.xlu0 %213 }
  0xbb   : > { %v215_v8 = vadd.f32 %v214_v7, %v211_v6 }
  0xbd   : > { %216 = vst.msk [vmem:[%s602_s2] sm:$0xff] %vm209_vm1, %v215_v8 }
  0xbe PF: > { %s16_s14 = sadd.s32 1, %s467_s14   ;;  %s606_s9 = smov %s451_s10 }
  0xbf   : > { %p13_p7 = scmp.ge.s32.totalorder %s16_s14, 4   ;;  %s607_s10 = smov %s455_s11 }
  0xc0   : > { %s608_s11 = smov %s535_s21  ;;  %s609_s12 = smov %s463_s13 }
  0xc1   : > { %s610_s13 = smov %s612_s16  ;;  %15 = sbr.rel (!%p13_p7) target bundleno = 4 (0x4), region = 80 }
  0xc6   :  { %250 = vsyncpa [#allocation3], 1 }
  0xc7   :  { %252 = vsyncpa [#allocation3 + $0x1], 1 }

</bundles_post_ra>
